<compile_context>
chip_gen: v5e
topology: v5e:2x2
jax: 0.10.0
libtpu: 0.0.40
codegen_flags: <defaults>
</compile_context>

<pallas_src>
import numpy as np
import jax
import jax.numpy as jnp
from jax.experimental import pallas as pl
from jax.experimental.pallas import tpu as pltpu


def _round_up(x, m):
    return ((x + m - 1) // m) * m


def _conv_as_matmul_nchw(weight_oihw, h, w):
    """Fold a 3x3 / stride-2 / pad-1 bias-free conv (OIHW weights) into a dense
    matrix K such that
        y_flat(N, Cout*Ho*Wo) = x_flat(N, Cin*H*W) @ K
    where x_flat / y_flat are NCHW tensors flattened over (C, H, W).
    Built by index scatter (no large dense intermediates)."""
    wnp = np.asarray(weight_oihw, dtype=np.float32)
    cout, cin = int(wnp.shape[0]), int(wnp.shape[1])
    ho, wo = (h + 1) // 2, (w + 1) // 2
    K = np.zeros((cin * h * w, cout * ho * wo), np.float32)
    c_idx = np.arange(cin)
    o_idx = np.arange(cout)
    for i in range(ho):
        for j in range(wo):
            q = i * wo + j
            for kh in range(3):
                for kw in range(3):
                    hi = 2 * i + kh - 1
                    wi = 2 * j + kw - 1
                    if 0 <= hi < h and 0 <= wi < w:
                        s = hi * w + wi
                        K[c_idx[:, None] * (h * w) + s,
                          o_idx[None, :] * (ho * wo) + q] = wnp[:, :, kh, kw].T
    return K, (ho, wo, cout)


def _make_fused_kernel(n_layers, offsets, widths):
    """Kernel body: input row-matrix -> chain of MXU GEMMs; each layer's
    activation is stored into its 128-aligned window of the output slab."""
    def kernel(*refs):
        x_ref = refs[0]
        k_refs = refs[1:1 + n_layers]
        o_ref = refs[1 + n_layers]
        # bf16 operands on the MXU, fp32 accumulation via preferred_element_type.
        act = x_ref[...].astype(jnp.bfloat16)
        for li in range(n_layers):
            acc = jnp.dot(act, k_refs[li][...],
                          preferred_element_type=jnp.float32)
            o_ref[:, offsets[li]:offsets[li] + widths[li]] = acc
            act = acc.astype(jnp.bfloat16)
    return kernel


class UpdateMaskPallas:
    """JAX/Pallas equivalent of Update_mask(feat_channels)."""

    def __init__(self, feat_channels, key):
        chans = [1] + list(feat_channels)
        self.weights = []  # OIHW, like PyTorch
        for i in range(4):
            key, sub = jax.random.split(key)
            cin, cout = chans[i], chans[i + 1]
            fan_in = cin * 3 * 3
            # deterministic synthetic init (stand-in for PyTorch kaiming-uniform)
            w = jax.random.normal(sub, (cout, cin, 3, 3), jnp.float32) * (
                1.0 / fan_in) ** 0.5
            self.weights.append(w)
        self._cache = {}  # (H, W) -> (kmats, jitted forward)

    def _build(self, H, W):
        h, w = H, W
        in_width = H * W  # Cin == 1
        kmats_np, out_meta, seg_sizes, pad_widths = [], [], [], []
        prev_width = in_width
        for wgt in self.weights:
            K, (ho, wo, cout) = _conv_as_matmul_nchw(wgt, h, w)
            # rows corresponding to the previous layer's zero-padded columns
            if K.shape[0] < prev_width:
                K = np.pad(K, ((0, prev_width - K.shape[0]), (0, 0)))
            seg = cout * ho * wo
            padded = _round_up(seg, 128)          # lane-dense, unmasked stores
            if padded > seg:
                K = np.pad(K, ((0, 0), (0, padded - seg)))
            kmats_np.append(K)
            out_meta.append((ho, wo, cout))
            seg_sizes.append(seg)
            pad_widths.append(padded)
            prev_width = padded
            h, w = ho, wo

        offsets, off = [], 0
        for pw in pad_widths:
            offsets.append(off)
            off += pw
        slab_width = off
        assert all(o % 128 == 0 for o in offsets), offsets
        assert all(pw % 128 == 0 for pw in pad_widths), pad_widths

        # bf16 constants: halve per-call HBM->VMEM weight traffic.
        kmats = [jnp.asarray(K, dtype=jnp.bfloat16) for K in kmats_np]
        k_bytes = sum(K.size * 2 for K in kmats_np)

        # Scaling guard: dense K bytes grow ~H^2*W^2*Cin*Cout and would exceed
        # v7x's 64 MiB VMEM (and scoped defaults) well before v5e/v6e.
        if k_bytes > 40 << 20:
            raise NotImplementedError(
                "dense conv-as-matmul path only supports small resolutions; "
                "use a pipelined/tiled-im2col path above ~32x32")

        kernel = _make_fused_kernel(len(kmats), tuple(offsets),
                                    tuple(pad_widths))
        n_in = 1 + len(kmats)
        flops_per_row = 2 * sum(K.shape[0] * K.shape[1] for K in kmats_np)
        max_pad = max(pad_widths)
        offsets_t, seg_t, meta_t = tuple(offsets), tuple(seg_sizes), tuple(out_meta)

        def forward(mask_nchw, kmats_in):
            n = mask_nchw.shape[0]
            # Cin == 1: NCHW flatten is a pure reshape (no transpose copy).
            x = mask_nchw.reshape(n, in_width)
            out_shape = jax.ShapeDtypeStruct((n, slab_width), jnp.float32)
            cost = pl.CostEstimate(
                flops=flops_per_row * n,
                transcendentals=0,
                bytes_accessed=n * in_width * 4 + k_bytes + n * slab_width * 4)
            vmem_need = (n * in_width * 4 + k_bytes + n * slab_width * 4
                         + n * max_pad * 8)
            vmem_limit = int(min(100 << 20, max(32 << 20, 2 * vmem_need)))

            tn = 256
            if n >= 2 * tn and n % tn == 0:
                # large-batch path: row-block grid, 'parallel' for v7x megacore
                slab = pl.pallas_call(
                    kernel,
                    out_shape=out_shape,
                    grid=(n // tn,),
                    in_specs=([pl.BlockSpec((tn, in_width), lambda i: (i, 0))]
                              + [pl.BlockSpec(K.shape, lambda i: (0, 0))
                                 for K in kmats_in]),
                    out_specs=pl.BlockSpec((tn, slab_width), lambda i: (i, 0)),
                    compiler_params=pltpu.CompilerParams(
                        dimension_semantics=("parallel",),
                        vmem_limit_bytes=vmem_limit),
                    cost_estimate=cost,
                )(x, *kmats_in)
            else:
                slab = pl.pallas_call(
                    kernel,
                    out_shape=out_shape,
                    in_specs=[pl.BlockSpec(
                        memory_space=pltpu.MemorySpace.VMEM)] * n_in,
                    out_specs=pl.BlockSpec(memory_space=pltpu.MemorySpace.VMEM),
                    compiler_params=pltpu.CompilerParams(
                        vmem_limit_bytes=vmem_limit),
                    cost_estimate=cost,
                )(x, *kmats_in)

            # Split the slab into the four NCHW feature maps (pure reshapes).
            outs = []
            for (ho, wo, cout), sz, offset in zip(meta_t, seg_t, offsets_t):
                seg = slab[:, offset:offset + sz]
                outs.append(seg.reshape(n, cout, ho, wo))
            return outs

        return kmats, jax.jit(forward)

    def __call__(self, mask_nchw):
        hw = (int(mask_nchw.shape[2]), int(mask_nchw.shape[3]))
        if hw not in self._cache:
            self._cache[hw] = self._build(*hw)
        kmats, fwd = self._cache[hw]
        return fwd(mask_nchw, kmats)


if __name__ == "__main__":
    key = jax.random.PRNGKey(0)
    k_x, k_p = jax.random.split(key)

    feat_channels = [8, 16, 32, 64]
    model = UpdateMaskPallas(feat_channels, k_p)

    mask = jax.random.normal(k_x, (2, 1, 16, 16), jnp.float32)  # NCHW, like PyTorch

    outs = model(mask)
    outs = jax.block_until_ready(outs)

    # Reference check against XLA's fp32 conv (same weights, stride 2, pad 1).
    # bf16 weights/activations in the kernel -> loosened (relative) tolerance.
    ref = mask
    expected_shapes = [(2, 8, 8, 8), (2, 16, 4, 4), (2, 32, 2, 2), (2, 64, 1, 1)]
    for wgt, o, es in zip(model.weights, outs, expected_shapes):
        ref = jax.lax.conv_general_dilated(
            ref, wgt,
            window_strides=(2, 2),
            padding=((1, 1), (1, 1)),
            dimension_numbers=("NCHW", "OIHW", "NCHW"))
        assert o.shape == es, (o.shape, es)
        err = float(jnp.max(jnp.abs(o - ref)))
        scale = float(jnp.max(jnp.abs(ref))) + 1e-6
        assert err <= 5e-2 * scale, (err, scale)

    print("KERNEL_OK")
</pallas_src>

<mosaic_0001>
module attributes {stable_mosaic.version = 11 : i64} {
  func.func @kernel(%arg0: memref<2x256xf32, #tpu.memory_space<vmem>>, %arg1: memref<256x512xbf16, #tpu.memory_space<vmem>>, %arg2: memref<512x256xbf16, #tpu.memory_space<vmem>>, %arg3: memref<256x128xbf16, #tpu.memory_space<vmem>>, %arg4: memref<128x128xbf16, #tpu.memory_space<vmem>>, %arg5: memref<2x1024xf32, #tpu.memory_space<vmem>>) attributes {dimension_semantics = [], scalar_prefetch = 0 : i64, scratch_operands = 0 : i64, tpu.core_type = #tpu.core_type<tc>} {
    %c0 = arith.constant 0 : index
    %c0_0 = arith.constant 0 : index
    %0 = vector.load %arg0[%c0, %c0_0] : memref<2x256xf32, #tpu.memory_space<vmem>>, vector<2x256xf32>
    %1 = arith.truncf %0 : vector<2x256xf32> to vector<2x256xbf16>
    %c0_1 = arith.constant 0 : index
    %c0_2 = arith.constant 0 : index
    %2 = vector.load %arg1[%c0_1, %c0_2] : memref<256x512xbf16, #tpu.memory_space<vmem>>, vector<256x512xbf16>
    %cst = arith.constant dense<0.000000e+00> : vector<2x512xf32>
    %3 = tpu.matmul %1, %2, %cst {dimension_numbers = #tpu.dot_dimension_numbers<[1], [0], [0], [1], [0, 0, 1, 1], [], []>} : vector<2x256xbf16>, vector<256x512xbf16>, vector<2x512xf32> -> vector<2x512xf32>
    %c0_3 = arith.constant 0 : index
    %c0_4 = arith.constant 0 : index
    %4 = vector.load %arg5[%c0_3, %c0_4] : memref<2x1024xf32, #tpu.memory_space<vmem>>, vector<2x512xf32>
    tpu.vector_store %arg5[%c0_3, %c0_4], %3 {strides = array<i32>} : memref<2x1024xf32, #tpu.memory_space<vmem>>, vector<2x512xf32>,
    %5 = arith.truncf %3 : vector<2x512xf32> to vector<2x512xbf16>
    %c0_5 = arith.constant 0 : index
    %c0_6 = arith.constant 0 : index
    %6 = vector.load %arg2[%c0_5, %c0_6] : memref<512x256xbf16, #tpu.memory_space<vmem>>, vector<512x256xbf16>
    %cst_7 = arith.constant dense<0.000000e+00> : vector<2x256xf32>
    %7 = tpu.matmul %5, %6, %cst_7 {dimension_numbers = #tpu.dot_dimension_numbers<[1], [0], [0], [1], [0, 0, 1, 1], [], []>} : vector<2x512xbf16>, vector<512x256xbf16>, vector<2x256xf32> -> vector<2x256xf32>
    %c0_8 = arith.constant 0 : index
    %c512 = arith.constant 512 : index
    %8 = vector.load %arg5[%c0_8, %c512] : memref<2x1024xf32, #tpu.memory_space<vmem>>, vector<2x256xf32>
    tpu.vector_store %arg5[%c0_8, %c512], %7 {strides = array<i32>} : memref<2x1024xf32, #tpu.memory_space<vmem>>, vector<2x256xf32>,
    %9 = arith.truncf %7 : vector<2x256xf32> to vector<2x256xbf16>
    %c0_9 = arith.constant 0 : index
    %c0_10 = arith.constant 0 : index
    %10 = vector.load %arg3[%c0_9, %c0_10] : memref<256x128xbf16, #tpu.memory_space<vmem>>, vector<256x128xbf16>
    %cst_11 = arith.constant dense<0.000000e+00> : vector<2x128xf32>
    %11 = tpu.matmul %9, %10, %cst_11 {dimension_numbers = #tpu.dot_dimension_numbers<[1], [0], [0], [1], [0, 0, 1, 1], [], []>} : vector<2x256xbf16>, vector<256x128xbf16>, vector<2x128xf32> -> vector<2x128xf32>
    %c0_12 = arith.constant 0 : index
    %c768 = arith.constant 768 : index
    %12 = vector.load %arg5[%c0_12, %c768] : memref<2x1024xf32, #tpu.memory_space<vmem>>, vector<2x128xf32>
    tpu.vector_store %arg5[%c0_12, %c768], %11 {strides = array<i32>} : memref<2x1024xf32, #tpu.memory_space<vmem>>, vector<2x128xf32>,
    %13 = arith.truncf %11 : vector<2x128xf32> to vector<2x128xbf16>
    %c0_13 = arith.constant 0 : index
    %c0_14 = arith.constant 0 : index
    %14 = vector.load %arg4[%c0_13, %c0_14] : memref<128x128xbf16, #tpu.memory_space<vmem>>, vector<128x128xbf16>
    %cst_15 = arith.constant dense<0.000000e+00> : vector<2x128xf32>
    %15 = tpu.matmul %13, %14, %cst_15 {dimension_numbers = #tpu.dot_dimension_numbers<[1], [0], [0], [1], [0, 0, 1, 1], [], []>} : vector<2x128xbf16>, vector<128x128xbf16>, vector<2x128xf32> -> vector<2x128xf32>
    %c0_16 = arith.constant 0 : index
    %c896 = arith.constant 896 : index
    %16 = vector.load %arg5[%c0_16, %c896] : memref<2x1024xf32, #tpu.memory_space<vmem>>, vector<2x128xf32>
    tpu.vector_store %arg5[%c0_16, %c896], %15 {strides = array<i32>} : memref<2x1024xf32, #tpu.memory_space<vmem>>, vector<2x128xf32>,
    return
  }
}

</mosaic_0001>

<bundles_post_ra>
// kernel: forward.1
= control target key start
LH: loop header
LB: loop body
LE: loop exit
PB: predicated region body
PF: predicated region fallthrough
CT: control target
= control target key end

     0   :  { %10 = vsyncpa [#allocation3], 0  ;;  %s2294_s0 = inlined_call_operand.vmem [shape: f32[2,256], index: 0, kind: input, shape index: {}]   ;;  %s2295_s1 = inlined_call_operand.hbm [shape: bf16[256,512], index: 1, kind: input, shape index: {}]   ;;  %s2296_s2 = inlined_call_operand.hbm [shape: bf16[512,256], index: 2, kind: input, shape index: {}]   ;;  %s2297_s3 = inlined_call_operand.hbm [shape: bf16[256,128], index: 3, kind: input, shape index: {}]   ;;  %s2298_s4 = inlined_call_operand.hbm [shape: bf16[128,128], index: 4, kind: input, shape index: {}]   ;;  %s2299_s5 = inlined_call_operand.vmem [shape: f32[2,1024], index: 5, kind: output, shape index: {}]  }
   0x1   :  { %11 = vsyncpa [#allocation5], 0  ;;  %s32_s20 = sshll.u32 %s2296_s2, 4  ;;  %s33_s20 = int_to_ptr.hbm [resolvable:$true] %s32_s20 }
   0x2   :  { %12 = vsyncpa [#allocation8], 0  ;;  %s2208_s21 = smov [#allocation4]   ;;  %s19_s25 = sshll.u32 %s2295_s1, 4  ;;  %s20_s25 = int_to_ptr.hbm [resolvable:$true] %s19_s25 }
   0x3   :  { %s34_s22 = sshll.u32 %s2208_s21, 4  ;;  %s2209_s26 = smov 128   ;;  %s35_s22 = int_to_ptr.vmem [resolvable:$true] %s34_s22 }
   0x4   :  { %s2210_s27 = smov 8   ;;  %s2211_s28 = smov [#allocation2]  }
   0x5   :  { %40 = dma.hbm_to_vmem [thread:$0]  %s33_s20, 8192, %s35_s22, [#allocation5], %s2209_s26, %s2209_s26, %s2210_s27  }
   0x6   :  { %s21_s29 = sshll.u32 %s2211_s28, 4  ;;  %s2212_s30 = smov 256   ;;  %s22_s29 = int_to_ptr.vmem [resolvable:$true] %s21_s29 }
   0x7   :  { %s2213_s6 = smov 16   ;;  %s45_s8 = sshll.u32 %s2297_s3, 4  ;;  %s46_s8 = int_to_ptr.hbm [resolvable:$true] %s45_s8 }
   0x8   :  { %27 = dma.hbm_to_vmem [thread:$0]  %s20_s25, 8192, %s22_s29, [#allocation3], %s2212_s30, %s2212_s30, %s2213_s6  }
   0x9   :  { %s2214_s9 = smov [#allocation6]   ;;  %s58_s12 = sshll.u32 %s2298_s4, 4  ;;  %s59_s12 = int_to_ptr.hbm [resolvable:$true] %s58_s12 }
   0xa   :  { %s47_s10 = sshll.u32 %s2214_s9, 4  ;;  %s2215_s13 = smov 64   ;;  %s48_s10 = int_to_ptr.vmem [resolvable:$true] %s47_s10 }
   0xb   :  { %s2216_s14 = smov 4   ;;  %s2217_s15 = smov [#allocation7]  }
   0xc   :  { %53 = dma.hbm_to_vmem [thread:$0]  %s46_s8, 2048, %s48_s10, [#allocation5], %s2215_s13, %s2215_s13, %s2216_s14  }
   0xd   :  { %s60_s16 = sshll.u32 %s2217_s15, 4  ;;  %s61_s16 = int_to_ptr.vmem [resolvable:$true] %s60_s16 }
   0xe   :  { %66 = dma.hbm_to_vmem [thread:$0]  %s59_s12, 1024, %s61_s16, [#allocation8], %s2215_s13, %s2215_s13, %s2216_s14  }
   0xf   :  { %2202 = dma.done.wait [#allocation3], 8192  }
  0x10   :  { %2203 = vsyncadd [#allocation3], 4294959104 }
  0x11   :  { %2204 = dma.done.wait [#allocation5], 10240  }
  0x12   :  { %2205 = vsyncadd [#allocation5], 4294957056 }
  0x13   :  { %2206 = dma.done.wait [#allocation8], 1024  }
  0x14   :  { %2207 = vsyncadd [#allocation8], 4294966272  ;;  %v1450_v0 = vld [vmem:[#allocation2 + $0xe0] sm:$0xf]  ;;  %v1974_v1 = vld [vmem:[#allocation2 + $0xec] sm:$0xf0] }
  0x15   :  { %v1578_v2 = vld [vmem:[#allocation2 + $0x1e0] sm:$0xf]  ;;  %v1451_v3 = vor.u32 %v1974_v1, %v1450_v0  ;;  %v2006_v4 = vld [vmem:[#allocation2 + $0x1ec] sm:$0xf0]  ;;  %v1972_v5 = vld [vmem:[#allocation2 + $0xe4] sm:$0xf] }
  0x16   :  { %v1452_v6 = vld [vmem:[#allocation2 + $0xf0] sm:$0xf0]  ;;  %v1579_v7 = vor.u32 %v2006_v4, %v1578_v2  ;;  %v2004_v9 = vld [vmem:[#allocation2 + $0x1e4] sm:$0xf]  ;;  %v1434_v11 = vld [vmem:[#allocation2 + $0xc0] sm:$0xf] }
  0x17   :  { %v1455_v8 = vor.u32 %v1972_v5, %v1452_v6  ;;  %v1580_v10 = vld [vmem:[#allocation2 + $0x1f0] sm:$0xf0]  ;;  %476 = vmatpush.bf16.msra.mxu0 %v1451_v3  ;;  %v1970_v13 = vld [vmem:[#allocation2 + $0xcc] sm:$0xf0]  ;;  %v1562_v14 = vld [vmem:[#allocation2 + $0x1c0] sm:$0xf] }
  0x18   :  { %v1583_v12 = vor.u32 %v2004_v9, %v1580_v10  ;;  %v2002_v15 = vld [vmem:[#allocation2 + $0x1cc] sm:$0xf0]  ;;  %489 = vmatpush.bf16.msra.mxu1 %v1579_v7  ;;  %v1435_v16 = vor.u32 %v1970_v13, %v1434_v11  ;;  %v1968_v18 = vld [vmem:[#allocation2 + $0xc4] sm:$0xf]  ;;  %v1436_v19 = vld [vmem:[#allocation2 + $0xd0] sm:$0xf0] }
  0x19   :  { %502 = vmatpush.bf16.msra.mxu2 %v1455_v8  ;;  %v1563_v17 = vor.u32 %v2002_v15, %v1562_v14  ;;  %v2000_v20 = vld [vmem:[#allocation2 + $0x1c4] sm:$0xf]  ;;  %v1439_v21 = vor.u32 %v1968_v18, %v1436_v19  ;;  %v1564_v22 = vld [vmem:[#allocation2 + $0x1d0] sm:$0xf0]  ;;  %v1418_v23 = vld [vmem:[#allocation2 + $0xa0] sm:$0xf] }
  0x1a   :  { %515 = vmatpush.bf16.msra.mxu3 %v1583_v12  ;;  %v1966_v24 = vld [vmem:[#allocation2 + $0xac] sm:$0xf0]  ;;  %v1567_v25 = vor.u32 %v2000_v20, %v1564_v22  ;;  %v1546_v26 = vld [vmem:[#allocation2 + $0x1a0] sm:$0xf]  ;;  %v1964_v28 = vld [vmem:[#allocation2 + $0xa4] sm:$0xf] }
  0x1b   :  { %v1998_v27 = vld [vmem:[#allocation2 + $0x1ac] sm:$0xf0]  ;;  %477 = vmatpush.bf16.msra.mxu0 %v1435_v16  ;;  %v1419_v29 = vor.u32 %v1966_v24, %v1418_v23  ;;  %v1420_v30 = vld [vmem:[#allocation2 + $0xb0] sm:$0xf0]  ;;  %v1996_v31 = vld [vmem:[#allocation2 + $0x1a4] sm:$0xf] }
  0x1c   :  { %v1548_v32 = vld [vmem:[#allocation2 + $0x1b0] sm:$0xf0]  ;;  %490 = vmatpush.bf16.msra.mxu1 %v1563_v17  ;;  %v1547_v33 = vor.u32 %v1998_v27, %v1546_v26  ;;  %v1423_v34 = vor.u32 %v1964_v28, %v1420_v30  ;;  %v1402_v35 = vld [vmem:[#allocation2 + $0x80] sm:$0xf]  ;;  %v1962_v36 = vld [vmem:[#allocation2 + $0x8c] sm:$0xf0] }
  0x1d   :  { %503 = vmatpush.bf16.msra.mxu2 %v1439_v21  ;;  %v1530_v37 = vld [vmem:[#allocation2 + $0x180] sm:$0xf]  ;;  %v1551_v38 = vor.u32 %v1996_v31, %v1548_v32  ;;  %v1994_v39 = vld [vmem:[#allocation2 + $0x18c] sm:$0xf0]  ;;  %v1960_v40 = vld [vmem:[#allocation2 + $0x84] sm:$0xf]  ;;  %v1403_v44 = vor.u32 %v1962_v36, %v1402_v35 }
  0x1e   :  { %516 = vmatpush.bf16.msra.mxu3 %v1567_v25  ;;  %v1404_v41 = vld [vmem:[#allocation2 + $0x90] sm:$0xf0]  ;;  %v1992_v42 = vld [vmem:[#allocation2 + $0x184] sm:$0xf]  ;;  %v1531_v45 = vor.u32 %v1994_v39, %v1530_v37  ;;  %v1386_v47 = vld [vmem:[#allocation2 + $0x60] sm:$0xf] }
  0x1f   :  { %v1532_v43 = vld [vmem:[#allocation2 + $0x190] sm:$0xf0]  ;;  %478 = vmatpush.bf16.msra.mxu0 %v1419_v29  ;;  %v1407_v46 = vor.u32 %v1960_v40, %v1404_v41  ;;  %v1958_v48 = vld [vmem:[#allocation2 + $0x6c] sm:$0xf0]  ;;  %v1514_v49 = vld [vmem:[#allocation2 + $0x160] sm:$0xf] }
  0x20   :  { %491 = vmatpush.bf16.msra.mxu1 %v1547_v33  ;;  %v1535_v50 = vor.u32 %v1992_v42, %v1532_v43  ;;  %v1990_v51 = vld [vmem:[#allocation2 + $0x16c] sm:$0xf0]  ;;  %v1956_v52 = vld [vmem:[#allocation2 + $0x64] sm:$0xf]  ;;  %v1388_v53 = vld [vmem:[#allocation2 + $0x70] sm:$0xf0]  ;;  %v1387_v56 = vor.u32 %v1958_v48, %v1386_v47 }
  0x21   :  { %504 = vmatpush.bf16.msra.mxu2 %v1423_v34  ;;  %v1988_v54 = vld [vmem:[#allocation2 + $0x164] sm:$0xf]  ;;  %v1516_v55 = vld [vmem:[#allocation2 + $0x170] sm:$0xf0]  ;;  %v1515_v57 = vor.u32 %v1990_v51, %v1514_v49  ;;  %v1391_v58 = vor.u32 %v1956_v52, %v1388_v53  ;;  %v1370_v59 = vld [vmem:[#allocation2 + $0x40] sm:$0xf] }
  0x22   :  { %517 = vmatpush.bf16.msra.mxu3 %v1551_v38  ;;  %v1954_v60 = vld [vmem:[#allocation2 + $0x4c] sm:$0xf0]  ;;  %v1498_v61 = vld [vmem:[#allocation2 + $0x140] sm:$0xf]  ;;  %v1519_v62 = vor.u32 %v1988_v54, %v1516_v55  ;;  %v1952_v0 = vld [vmem:[#allocation2 + $0x44] sm:$0xf] }
  0x23   :  { %479 = vmatpush.bf16.msra.mxu0 %v1403_v44  ;;  %v1986_v63 = vld [vmem:[#allocation2 + $0x14c] sm:$0xf0]  ;;  %v1372_v1 = vld [vmem:[#allocation2 + $0x50] sm:$0xf0]  ;;  %v1984_v2 = vld [vmem:[#allocation2 + $0x144] sm:$0xf]  ;;  %v1371_v4 = vor.u32 %v1954_v60, %v1370_v59 }
  0x24   :  { %492 = vmatpush.bf16.msra.mxu1 %v1531_v45  ;;  %v1500_v3 = vld [vmem:[#allocation2 + $0x150] sm:$0xf0]  ;;  %v1499_v5 = vor.u32 %v1986_v63, %v1498_v61  ;;  %v1375_v6 = vor.u32 %v1952_v0, %v1372_v1  ;;  %v1354_v7 = vld [vmem:[#allocation2 + $0x20] sm:$0xf]  ;;  %v1950_v8 = vld [vmem:[#allocation2 + $0x2c] sm:$0xf0] }
  0x25   :  { %505 = vmatpush.bf16.msra.mxu2 %v1407_v46  ;;  %v1482_v9 = vld [vmem:[#allocation2 + $0x120] sm:$0xf]  ;;  %v1503_v10 = vor.u32 %v1984_v2, %v1500_v3  ;;  %v1982_v11 = vld [vmem:[#allocation2 + $0x12c] sm:$0xf0]  ;;  %v1948_v12 = vld [vmem:[#allocation2 + $0x24] sm:$0xf]  ;;  %v1355_v17 = vor.u32 %v1950_v8, %v1354_v7 }
  0x26   :  { %518 = vmatpush.bf16.msra.mxu3 %v1535_v50  ;;  %v1356_v13 = vld [vmem:[#allocation2 + $0x30] sm:$0xf0]  ;;  %v1980_v14 = vld [vmem:[#allocation2 + $0x124] sm:$0xf]  ;;  %v1338_v16 = vld [vmem:[#allocation2] sm:$0xf]  ;;  %v1483_v21 = vor.u32 %v1982_v11, %v1482_v9 }
  0x27   :  { %480 = vmatpush.bf16.msra.mxu0 %v1387_v56  ;;  %v1484_v15 = vld [vmem:[#allocation2 + $0x130] sm:$0xf0]  ;;  %v1946_v18 = vld [vmem:[#allocation2 + $0xc] sm:$0xf0]  ;;  %v1466_v19 = vld [vmem:[#allocation2 + $0x100] sm:$0xf]  ;;  %v1359_v22 = vor.u32 %v1948_v12, %v1356_v13 }
  0x28   :  { %493 = vmatpush.bf16.msra.mxu1 %v1515_v57  ;;  %v1978_v20 = vld [vmem:[#allocation2 + $0x10c] sm:$0xf0]  ;;  %v1944_v23 = vld [vmem:[#allocation2 + $0x4] sm:$0xf]  ;;  %v1340_v24 = vld [vmem:[#allocation2 + $0x10] sm:$0xf0]  ;;  %v1487_v26 = vor.u32 %v1980_v14, %v1484_v15  ;;  %v1339_v32 = vor.u32 %v1946_v18, %v1338_v16 }
  0x29   :  { %506 = vmatpush.bf16.msra.mxu2 %v1391_v58  ;;  %v83_v25 = vld [vmem:[%s2294_s0] sm:$0xf]  ;;  %v1976_v27 = vld [vmem:[#allocation2 + $0x104] sm:$0xf]  ;;  %v1468_v28 = vld [vmem:[#allocation2 + $0x110] sm:$0xf0]  ;;  %v1467_v36 = vor.u32 %v1978_v20, %v1466_v19  ;;  %v1343_v37 = vor.u32 %v1944_v23, %v1340_v24 }
  0x2a   :  { %519 = vmatpush.bf16.msra.mxu3 %v1519_v62  ;;  %85 = vst [vmem:[#allocation1] ss:$4 sm:$0xff] %v83_v25  ;;  %v1458_v29 = vld [vmem:[#allocation2 + $0xe8] sm:$0xf]  ;;  %v1975_v30 = vld [vmem:[#allocation2 + $0xf4] sm:$0xf0]  ;;  %v1471_v40 = vor.u32 %v1976_v27, %v1468_v28 }
  0x2b   :  { %481 = vmatpush.bf16.msra.mxu0 %v1371_v4  ;;  %v1586_v31 = vld [vmem:[#allocation2 + $0x1e8] sm:$0xf]  ;;  %v2007_v33 = vld [vmem:[#allocation2 + $0x1f4] sm:$0xf0]  ;;  %v1973_v34 = vld [vmem:[#allocation2 + $0xec] sm:$0xf]  ;;  %v1459_v41 = vor.u32 %v1975_v30, %v1458_v29 }
  0x2c   :  { %494 = vmatpush.bf16.msra.mxu1 %v1499_v5  ;;  %v1460_v35 = vld [vmem:[#allocation2 + $0xf8] sm:$0xf0]  ;;  %v2005_v38 = vld [vmem:[#allocation2 + $0x1ec] sm:$0xf]  ;;  %v1442_v42 = vld [vmem:[#allocation2 + $0xc8] sm:$0xf]  ;;  %v1587_v44 = vor.u32 %v2007_v33, %v1586_v31 }
  0x2d   :  { %507 = vmatpush.bf16.msra.mxu2 %v1375_v6  ;;  %v1588_v39 = vld [vmem:[#allocation2 + $0x1f8] sm:$0xf0]  ;;  %v1971_v43 = vld [vmem:[#allocation2 + $0xd4] sm:$0xf0]  ;;  %v1463_v45 = vor.u32 %v1973_v34, %v1460_v35  ;;  %v1570_v46 = vld [vmem:[#allocation2 + $0x1c8] sm:$0xf] }
  0x2e   :  { %520 = vmatpush.bf16.msra.mxu3 %v1503_v10  ;;  %v2003_v47 = vld [vmem:[#allocation2 + $0x1d4] sm:$0xf0]  ;;  %v1969_v48 = vld [vmem:[#allocation2 + $0xcc] sm:$0xf]  ;;  %v1591_v49 = vor.u32 %v2005_v38, %v1588_v39  ;;  %v1444_v50 = vld [vmem:[#allocation2 + $0xd8] sm:$0xf0]  ;;  %v1443_v57 = vor.u32 %v1971_v43, %v1442_v42 }
  0x2f   :  { %482 = vmatpush.bf16.msra.mxu0 %v1355_v17  ;;  %v2001_v51 = vld [vmem:[#allocation2 + $0x1cc] sm:$0xf]  ;;  %v1572_v52 = vld [vmem:[#allocation2 + $0x1d8] sm:$0xf0]  ;;  %v1571_v58 = vor.u32 %v2003_v47, %v1570_v46  ;;  %v1447_v59 = vor.u32 %v1969_v48, %v1444_v50  ;;  %v1426_v60 = vld [vmem:[#allocation2 + $0xa8] sm:$0xf] }
  0x30   :  { %495 = vmatpush.bf16.msra.mxu1 %v1483_v21  ;;  %v1967_v61 = vld [vmem:[#allocation2 + $0xb4] sm:$0xf0]  ;;  %v1554_v62 = vld [vmem:[#allocation2 + $0x1a8] sm:$0xf]  ;;  %v1575_v63 = vor.u32 %v2001_v51, %v1572_v52  ;;  %v1965_v1 = vld [vmem:[#allocation2 + $0xac] sm:$0xf] }
  0x31   :  { %508 = vmatpush.bf16.msra.mxu2 %v1359_v22  ;;  %v86_v53 = vld.sshfl [vmem:[#allocation1] sm:$0xff pattern:$0x73625140]  ;;  %v87_v54 = vld.sshfl [vmem:[#allocation1 + $0x8] sm:$0xff pattern:$0x73625140]  ;;  %v1427_v5 = vor.u32 %v1967_v61, %v1426_v60 }
  0x32   :  { %521 = vmatpush.bf16.msra.mxu3 %v1487_v26  ;;  %v2263_v55 = vpack.c.bf16 %v86_v53, %v86_v53  ;;  %v2265_v56 = vpack.c.bf16 %v87_v54, %v87_v54  ;;  %v1999_v0 = vld [vmem:[#allocation2 + $0x1b4] sm:$0xf0]  ;;  %v1428_v2 = vld [vmem:[#allocation2 + $0xb8] sm:$0xf0]  ;;  %v1997_v3 = vld [vmem:[#allocation2 + $0x1ac] sm:$0xf] }
  0x33   :  { %483 = vmatpush.bf16.msra.mxu0 %v1339_v32  ;;  %v1556_v4 = vld [vmem:[#allocation2 + $0x1b8] sm:$0xf0]  ;;  %v1555_v6 = vor.u32 %v1999_v0, %v1554_v62  ;;  %v1431_v7 = vor.u32 %v1965_v1, %v1428_v2  ;;  %v1410_v8 = vld [vmem:[#allocation2 + $0x88] sm:$0xf]  ;;  %v1963_v9 = vld [vmem:[#allocation2 + $0x94] sm:$0xf0] }
  0x34   :  { %496 = vmatpush.bf16.msra.mxu1 %v1467_v36  ;;  %v1538_v10 = vld [vmem:[#allocation2 + $0x188] sm:$0xf]  ;;  %v1559_v11 = vor.u32 %v1997_v3, %v1556_v4  ;;  %v1995_v12 = vld [vmem:[#allocation2 + $0x194] sm:$0xf0]  ;;  %v1961_v13 = vld [vmem:[#allocation2 + $0x8c] sm:$0xf]  ;;  %v1411_v17 = vor.u32 %v1963_v9, %v1410_v8 }
  0x35   :  { %509 = vmatpush.bf16.msra.mxu2 %v1343_v37  ;;  %v1412_v14 = vld [vmem:[#allocation2 + $0x98] sm:$0xf0]  ;;  %v1993_v15 = vld [vmem:[#allocation2 + $0x18c] sm:$0xf]  ;;  %v1539_v18 = vor.u32 %v1995_v12, %v1538_v10  ;;  %v1394_v20 = vld [vmem:[#allocation2 + $0x68] sm:$0xf] }
  0x36   :  { %522 = vmatpush.bf16.msra.mxu3 %v1471_v40  ;;  %484 = vmatmul.bf16.vlgmr.msra.gmra.mxu0 %v2263_v55  ;;  %v1540_v16 = vld [vmem:[#allocation2 + $0x198] sm:$0xf0]  ;;  %v1415_v19 = vor.u32 %v1961_v13, %v1412_v14  ;;  %v1959_v21 = vld [vmem:[#allocation2 + $0x74] sm:$0xf0]  ;;  %v1522_v22 = vld [vmem:[#allocation2 + $0x168] sm:$0xf] }
  0x37   :  { %528 = vmatpush.bf16.msrb.mxu0 %v1459_v41  ;;  %497 = vmatmul.bf16.vlgmr.msra.gmra.mxu1 %v2265_v56  ;;  %v1543_v23 = vor.u32 %v1993_v15, %v1540_v16  ;;  %v1991_v24 = vld [vmem:[#allocation2 + $0x174] sm:$0xf0]  ;;  %v1957_v25 = vld [vmem:[#allocation2 + $0x6c] sm:$0xf]  ;;  %v1396_v26 = vld [vmem:[#allocation2 + $0x78] sm:$0xf0]  ;;  %v1395_v29 = vor.u32 %v1959_v21, %v1394_v20 }
  0x38   :  { %541 = vmatpush.bf16.msrb.mxu1 %v1587_v44  ;;  %510 = vmatmul.bf16.vlgmr.msra.gmra.mxu2 %v2263_v55  ;;  %v1989_v27 = vld [vmem:[#allocation2 + $0x16c] sm:$0xf]  ;;  %v1524_v28 = vld [vmem:[#allocation2 + $0x178] sm:$0xf0]  ;;  %v1523_v30 = vor.u32 %v1991_v24, %v1522_v22  ;;  %v1399_v31 = vor.u32 %v1957_v25, %v1396_v26  ;;  %v1378_v32 = vld [vmem:[#allocation2 + $0x48] sm:$0xf] }
  0x39   :  { %554 = vmatpush.bf16.msrb.mxu2 %v1463_v45  ;;  %523 = vmatmul.bf16.vlgmr.msra.gmra.mxu3 %v2265_v56  ;;  %v1955_v33 = vld [vmem:[#allocation2 + $0x54] sm:$0xf0]  ;;  %v1506_v34 = vld [vmem:[#allocation2 + $0x148] sm:$0xf]  ;;  %v1527_v35 = vor.u32 %v1989_v27, %v1524_v28  ;;  %v1953_v37 = vld [vmem:[#allocation2 + $0x4c] sm:$0xf] }
  0x3a   :  { %567 = vmatpush.bf16.msrb.mxu3 %v1591_v49  ;;  %v1987_v36 = vld [vmem:[#allocation2 + $0x154] sm:$0xf0]  ;;  %v1380_v38 = vld [vmem:[#allocation2 + $0x58] sm:$0xf0]  ;;  %v1985_v39 = vld [vmem:[#allocation2 + $0x14c] sm:$0xf]  ;;  %v1379_v41 = vor.u32 %v1955_v33, %v1378_v32 }
  0x3b   :  { %529 = vmatpush.bf16.msrb.mxu0 %v1443_v57  ;;  %v1508_v40 = vld [vmem:[#allocation2 + $0x158] sm:$0xf0]  ;;  %v1507_v42 = vor.u32 %v1987_v36, %v1506_v34  ;;  %v1383_v43 = vor.u32 %v1953_v37, %v1380_v38  ;;  %v1362_v44 = vld [vmem:[#allocation2 + $0x28] sm:$0xf]  ;;  %v1951_v45 = vld [vmem:[#allocation2 + $0x34] sm:$0xf0] }
  0x3c   :  { %542 = vmatpush.bf16.msrb.mxu1 %v1571_v58  ;;  %v1490_v46 = vld [vmem:[#allocation2 + $0x128] sm:$0xf]  ;;  %v1511_v47 = vor.u32 %v1985_v39, %v1508_v40  ;;  %v1983_v48 = vld [vmem:[#allocation2 + $0x134] sm:$0xf0]  ;;  %v1949_v49 = vld [vmem:[#allocation2 + $0x2c] sm:$0xf]  ;;  %v1363_v53 = vor.u32 %v1951_v45, %v1362_v44 }
  0x3d   :  { %555 = vmatpush.bf16.msrb.mxu2 %v1447_v59  ;;  %v1364_v50 = vld [vmem:[#allocation2 + $0x38] sm:$0xf0]  ;;  %v1981_v51 = vld [vmem:[#allocation2 + $0x12c] sm:$0xf]  ;;  %v1346_v54 = vld [vmem:[#allocation2 + $0x8] sm:$0xf]  ;;  %v1491_v57 = vor.u32 %v1983_v48, %v1490_v46 }
  0x3e   :  { %568 = vmatpush.bf16.msrb.mxu3 %v1575_v63  ;;  %v1492_v52 = vld [vmem:[#allocation2 + $0x138] sm:$0xf0]  ;;  %v1367_v58 = vor.u32 %v1949_v49, %v1364_v50  ;;  %v1947_v59 = vld [vmem:[#allocation2 + $0x14] sm:$0xf0]  ;;  %v1474_v60 = vld [vmem:[#allocation2 + $0x108] sm:$0xf] }
  0x3f   :  { %530 = vmatpush.bf16.msrb.mxu0 %v1427_v5  ;;  %v1979_v61 = vld [vmem:[#allocation2 + $0x114] sm:$0xf0]  ;;  %v1495_v62 = vor.u32 %v1981_v51, %v1492_v52  ;;  %v1945_v63 = vld [vmem:[#allocation2 + $0xc] sm:$0xf]  ;;  %v1348_v0 = vld [vmem:[#allocation2 + $0x18] sm:$0xf0]  ;;  %v1347_v5 = vor.u32 %v1947_v59, %v1346_v54 }
  0x40   :  { %543 = vmatpush.bf16.msrb.mxu1 %v1555_v6  ;;  %v1977_v1 = vld [vmem:[#allocation2 + $0x10c] sm:$0xf]  ;;  %v1476_v2 = vld [vmem:[#allocation2 + $0x118] sm:$0xf0]  ;;  %v1650_v3 = vld [vmem:[#allocation4 + $0x70] sm:$0xf]  ;;  %v1475_v8 = vor.u32 %v1979_v61, %v1474_v60  ;;  %v1351_v9 = vor.u32 %v1945_v63, %v1348_v0 }
  0x41   :  { %556 = vmatpush.bf16.msrb.mxu2 %v1431_v7  ;;  %v2023_v4 = vld [vmem:[#allocation4 + $0x74] sm:$0xf0]  ;;  %v1714_v6 = vld [vmem:[#allocation4 + $0xf0] sm:$0xf]  ;;  %v1479_v10 = vor.u32 %v1977_v1, %v1476_v2  ;;  %v1642_v14 = vld [vmem:[#allocation4 + $0x60] sm:$0xf] }
  0x42   :  { %569 = vmatpush.bf16.msrb.mxu3 %v1559_v11  ;;  %v2039_v7 = vld [vmem:[#allocation4 + $0xf4] sm:$0xf0]  ;;  %v1651_v11 = vor.u32 %v2023_v4, %v1650_v3  ;;  %v1778_v12 = vld [vmem:[#allocation4 + $0x170] sm:$0xf]  ;;  %v2021_v15 = vld [vmem:[#allocation4 + $0x64] sm:$0xf0] }
  0x43   :  { %531 = vmatpush.bf16.msrb.mxu0 %v1411_v17  ;;  %v2055_v13 = vld [vmem:[#allocation4 + $0x174] sm:$0xf0]  ;;  %v1715_v16 = vor.u32 %v2039_v7, %v1714_v6  ;;  %v1706_v17 = vld [vmem:[#allocation4 + $0xe0] sm:$0xf]  ;;  %v1643_v20 = vor.u32 %v2021_v15, %v1642_v14  ;;  %v2053_v22 = vld [vmem:[#allocation4 + $0x164] sm:$0xf0] }
  0x44   :  { %544 = vmatpush.bf16.msrb.mxu1 %v1539_v18  ;;  %v2037_v18 = vld [vmem:[#allocation4 + $0xe4] sm:$0xf0]  ;;  %v1770_v21 = vld [vmem:[#allocation4 + $0x160] sm:$0xf]  ;;  %v2019_v24 = vld [vmem:[#allocation4 + $0x54] sm:$0xf0] }
  0x45   :  { %557 = vmatpush.bf16.msrb.mxu2 %v1415_v19  ;;  %v1779_v19 = vor.u32 %v2055_v13, %v1778_v12  ;;  %v1707_v25 = vor.u32 %v2037_v18, %v1706_v17  ;;  %v1842_v26 = vld [vmem:[#allocation4 + $0x1f0] sm:$0xf]  ;;  %v2035_v28 = vld [vmem:[#allocation4 + $0xd4] sm:$0xf0]  ;;  %v2017_v36 = vld [vmem:[#allocation4 + $0x44] sm:$0xf0] }
  0x46   :  { %570 = vmatpush.bf16.msrb.mxu3 %v1543_v23  ;;  %v1634_v23 = vld [vmem:[#allocation4 + $0x50] sm:$0xf]  ;;  %v2051_v34 = vld [vmem:[#allocation4 + $0x154] sm:$0xf0]  ;;  %v1690_v38 = vld [vmem:[#allocation4 + $0xc0] sm:$0xf] }
  0x47   :  { %532 = vmatpush.bf16.msrb.mxu0 %v1395_v29  ;;  %v1698_v27 = vld [vmem:[#allocation4 + $0xd0] sm:$0xf]  ;;  %v2071_v29 = vld [vmem:[#allocation4 + $0x1f4] sm:$0xf0]  ;;  %v1635_v32 = vor.u32 %v2019_v24, %v1634_v23  ;;  %v2033_v39 = vld [vmem:[#allocation4 + $0xc4] sm:$0xf0] }
  0x48   :  { %545 = vmatpush.bf16.msrb.mxu1 %v1523_v30  ;;  %v1771_v30 = vor.u32 %v2053_v22, %v1770_v21  ;;  %v1762_v33 = vld [vmem:[#allocation4 + $0x150] sm:$0xf]  ;;  %v1699_v37 = vor.u32 %v2035_v28, %v1698_v27  ;;  %v2031_v44 = vld [vmem:[#allocation4 + $0xb4] sm:$0xf0]  ;;  %v1610_v46 = vld [vmem:[#allocation4 + $0x20] sm:$0xf] }
  0x49   :  { %558 = vmatpush.bf16.msrb.mxu2 %v1399_v31  ;;  %v1843_v31 = vor.u32 %v2071_v29, %v1842_v26  ;;  %v1674_v49 = vld [vmem:[#allocation4 + $0xa0] sm:$0xf]  ;;  %v2029_v50 = vld [vmem:[#allocation4 + $0xa4] sm:$0xf0]  ;;  %v1602_v52 = vld [vmem:[#allocation4 + $0x10] sm:$0xf] }
  0x4a   :  { %571 = vmatpush.bf16.msrb.mxu3 %v1527_v35  ;;  %v1626_v35 = vld [vmem:[#allocation4 + $0x40] sm:$0xf]  ;;  %v1675_v54 = vor.u32 %v2029_v50, %v1674_v49  ;;  %v2009_v61 = vld [vmem:[#allocation4 + $0x4] sm:$0xf0]  ;;  %v1652_v0 = vld [vmem:[#allocation4 + $0x78] sm:$0xf0] }
  0x4b   :  { %533 = vmatpush.bf16.msrb.mxu0 %v1379_v41  ;;  %v1627_v40 = vor.u32 %v2017_v36, %v1626_v35  ;;  %v2015_v41 = vld [vmem:[#allocation4 + $0x34] sm:$0xf0]  ;;  %v1594_v60 = vld [vmem:[#allocation4] sm:$0xf]  ;;  %v2025_v2 = vld [vmem:[#allocation4 + $0x84] sm:$0xf0] }
  0x4c   :  { %546 = vmatpush.bf16.msrb.mxu1 %v1507_v42  ;;  %v1691_v42 = vor.u32 %v2033_v39, %v1690_v38  ;;  %v1658_v1 = vld [vmem:[#allocation4 + $0x80] sm:$0xf]  ;;  %v2038_v3 = vld [vmem:[#allocation4 + $0xf4] sm:$0xf]  ;;  %v1716_v4 = vld [vmem:[#allocation4 + $0xf8] sm:$0xf0] }
  0x4d   :  { %559 = vmatpush.bf16.msrb.mxu2 %v1383_v43  ;;  %v1682_v43 = vld [vmem:[#allocation4 + $0xb0] sm:$0xf]  ;;  %v1659_v7 = vor.u32 %v2025_v2, %v1658_v1  ;;  %v2018_v12 = vld [vmem:[#allocation4 + $0x54] sm:$0xf]  ;;  %v1636_v13 = vld [vmem:[#allocation4 + $0x58] sm:$0xf0] }
  0x4e   :  { %572 = vmatpush.bf16.msrb.mxu3 %v1511_v47  ;;  %v2013_v47 = vld [vmem:[#allocation4 + $0x24] sm:$0xf0]  ;;  %v1683_v48 = vor.u32 %v2031_v44, %v1682_v43  ;;  %v1639_v14 = vor.u32 %v2018_v12, %v1636_v13  ;;  %v1834_v15 = vld [vmem:[#allocation4 + $0x1e0] sm:$0xf]  ;;  %v2036_v17 = vld [vmem:[#allocation4 + $0xe4] sm:$0xf] }
  0x4f   :  { %534 = vmatpush.bf16.msrb.mxu0 %v1363_v53  ;;  %v1611_v51 = vor.u32 %v2013_v47, %v1610_v46  ;;  %v2011_v53 = vld [vmem:[#allocation4 + $0x14] sm:$0xf0]  ;;  %v1754_v21 = vld [vmem:[#allocation4 + $0x140] sm:$0xf]  ;;  %v2049_v22 = vld [vmem:[#allocation4 + $0x144] sm:$0xf0] }
  0x50   :  { %547 = vmatpush.bf16.msrb.mxu1 %v1491_v57  ;;  %v1666_v57 = vld [vmem:[#allocation4 + $0x90] sm:$0xf]  ;;  %v1603_v59 = vor.u32 %v2011_v53, %v1602_v52  ;;  %v2016_v23 = vld [vmem:[#allocation4 + $0x44] sm:$0xf]  ;;  %v1755_v24 = vor.u32 %v2049_v22, %v1754_v21  ;;  %v2067_v28 = vld [vmem:[#allocation4 + $0x1d4] sm:$0xf0] }
  0x51   :  { %560 = vmatpush.bf16.msrb.mxu2 %v1367_v58  ;;  %v2027_v58 = vld [vmem:[#allocation4 + $0x94] sm:$0xf0]  ;;  %v1826_v27 = vld [vmem:[#allocation4 + $0x1d0] sm:$0xf]  ;;  %v2034_v29 = vld [vmem:[#allocation4 + $0xd4] sm:$0xf] }
  0x52   :  { %573 = vmatpush.bf16.msrb.mxu3 %v1495_v62  ;;  %v2022_v62 = vld [vmem:[#allocation4 + $0x74] sm:$0xf]  ;;  %v1667_v63 = vor.u32 %v2027_v58, %v1666_v57  ;;  %v1818_v39 = vld [vmem:[#allocation4 + $0x1c0] sm:$0xf]  ;;  %v2045_v44 = vld [vmem:[#allocation4 + $0x124] sm:$0xf0] }
  0x53   :  { %535 = vmatpush.bf16.msrb.mxu0 %v1347_v5  ;;  %v1595_v5 = vor.u32 %v2009_v61, %v1594_v60  ;;  %v1655_v6 = vor.u32 %v2022_v62, %v1652_v0  ;;  %v2014_v35 = vld [vmem:[#allocation4 + $0x34] sm:$0xf]  ;;  %v1738_v43 = vld [vmem:[#allocation4 + $0x120] sm:$0xf]  ;;  %v1612_v47 = vld [vmem:[#allocation4 + $0x28] sm:$0xf0] }
  0x54   :  { %548 = vmatpush.bf16.msrb.mxu1 %v1475_v8  ;;  %v2020_v8 = vld [vmem:[#allocation4 + $0x64] sm:$0xf]  ;;  %v1739_v46 = vor.u32 %v2045_v44, %v1738_v43  ;;  %v1810_v49 = vld [vmem:[#allocation4 + $0x1b0] sm:$0xf]  ;;  %v2063_v50 = vld [vmem:[#allocation4 + $0x1b4] sm:$0xf0] }
  0x55   :  { %561 = vmatpush.bf16.msrb.mxu2 %v1351_v9  ;;  %v1644_v9 = vld [vmem:[#allocation4 + $0x68] sm:$0xf0]  ;;  %v2030_v52 = vld [vmem:[#allocation4 + $0xb4] sm:$0xf]  ;;  %v1684_v53 = vld [vmem:[#allocation4 + $0xb8] sm:$0xf0] }
  0x56   :  { %574 = vmatpush.bf16.msrb.mxu3 %v1479_v10  ;;  %536 = vmatmul.bf16.vlgmr.msrb.gmra.mxu0 %v2263_v55  ;;  %v1719_v10 = vor.u32 %v2038_v3, %v1716_v4  ;;  %v1730_v57 = vld [vmem:[#allocation4 + $0x110] sm:$0xf]  ;;  %v2043_v58 = vld [vmem:[#allocation4 + $0x114] sm:$0xf0]  ;;  %v1604_v61 = vld [vmem:[#allocation4 + $0x18] sm:$0xf0] }
  0x57   :  { %983 = vmatpush.bf16.msra.mxu0 %v1651_v11  ;;  %549 = vmatmul.bf16.vlgmr.msrb.gmra.mxu1 %v2265_v56  ;;  %v1647_v11 = vor.u32 %v2020_v8, %v1644_v9  ;;  %v1731_v60 = vor.u32 %v2043_v58, %v1730_v57  ;;  %v1802_v62 = vld [vmem:[#allocation4 + $0x1a0] sm:$0xf]  ;;  %v2028_v2 = vld [vmem:[#allocation4 + $0xa4] sm:$0xf]  ;;  %v1676_v3 = vld [vmem:[#allocation4 + $0xa8] sm:$0xf0] }
  0x58   :  { %996 = vmatpush.bf16.msra.mxu1 %v1715_v16  ;;  %562 = vmatmul.bf16.vlgmr.msrb.gmra.mxu2 %v2263_v55  ;;  %v1763_v55 = vor.u32 %v2051_v34, %v1762_v33  ;;  %v2069_v16 = vld [vmem:[#allocation4 + $0x1e4] sm:$0xf0]  ;;  %v1746_v33 = vld [vmem:[#allocation4 + $0x130] sm:$0xf]  ;;  %v2047_v34 = vld [vmem:[#allocation4 + $0x134] sm:$0xf0] }
  0x59   :  { %575 = vmatmul.bf16.vlgmr.msrb.gmra.mxu3 %v2265_v56  ;;  %1009 = vmatpush.bf16.msra.mxu2 %v1779_v19  ;;  %v1618_v56 = vld [vmem:[#allocation4 + $0x30] sm:$0xf]  ;;  %v1835_v18 = vor.u32 %v2069_v16, %v1834_v15  ;;  %v1708_v19 = vld [vmem:[#allocation4 + $0xe8] sm:$0xf0]  ;;  %v1747_v36 = vor.u32 %v2047_v34, %v1746_v33  ;;  %v1722_v4 = vld [vmem:[#allocation4 + $0x100] sm:$0xf] }
  0x5a   :  { %1022 = vmatpush.bf16.msra.mxu3 %v1843_v31  ;;  %v1619_v45 = vor.u32 %v2015_v41, %v1618_v56  ;;  %v1700_v31 = vld [vmem:[#allocation4 + $0xd8] sm:$0xf0]  ;;  %v1692_v41 = vld [vmem:[#allocation4 + $0xc8] sm:$0xf0]  ;;  %v1794_v13 = vld [vmem:[#allocation4 + $0x190] sm:$0xf] }
  0x5b   :  { %984 = vmatpush.bf16.msra.mxu0 %v1643_v20  ;;  %v1711_v20 = vor.u32 %v2036_v17, %v1708_v19  ;;  %v1596_v8 = vld [vmem:[#allocation4 + $0x8] sm:$0xf0]  ;;  %v1780_v12 = vld [vmem:[#allocation4 + $0x178] sm:$0xf0]  ;;  %v2059_v15 = vld [vmem:[#allocation4 + $0x194] sm:$0xf0] }
  0x5c   :  { %997 = vmatpush.bf16.msra.mxu1 %v1707_v25  ;;  %v1628_v25 = vld [vmem:[#allocation4 + $0x48] sm:$0xf0]  ;;  %v2026_v16 = vld [vmem:[#allocation4 + $0x94] sm:$0xf]  ;;  %v1668_v17 = vld [vmem:[#allocation4 + $0x98] sm:$0xf0] }
  0x5d   :  { %1010 = vmatpush.bf16.msra.mxu2 %v1771_v30  ;;  %v1631_v26 = vor.u32 %v2016_v23, %v1628_v25  ;;  %v1827_v30 = vor.u32 %v2067_v28, %v1826_v27  ;;  %v1671_v19 = vor.u32 %v2026_v16, %v1668_v17  ;;  %v1772_v21 = vld [vmem:[#allocation4 + $0x168] sm:$0xf0]  ;;  %v1786_v22 = vld [vmem:[#allocation4 + $0x180] sm:$0xf]  ;;  %v2024_v25 = vld [vmem:[#allocation4 + $0x84] sm:$0xf] }
  0x5e   :  { %1023 = vmatpush.bf16.msra.mxu3 %v1835_v18  ;;  %v1795_v18 = vor.u32 %v2059_v15, %v1794_v13  ;;  %v1764_v33 = vld [vmem:[#allocation4 + $0x158] sm:$0xf0]  ;;  %v2056_v16 = vld [vmem:[#allocation4 + $0x184] sm:$0xf]  ;;  %v1788_v17 = vld [vmem:[#allocation4 + $0x188] sm:$0xf0] }
  0x5f   :  { %985 = vmatpush.bf16.msra.mxu0 %v1635_v32  ;;  %v1703_v32 = vor.u32 %v2034_v29, %v1700_v31  ;;  %v2070_v29 = vld [vmem:[#allocation4 + $0x1f4] sm:$0xf]  ;;  %vm587_vm0 = vcmask 1041408   ;;  %vm589_vm1 = vcmask 1045508   ;;  %vm591_vm2 = vcmask 1043456  }
  0x60   :  { %998 = vmatpush.bf16.msra.mxu1 %v1699_v37  ;;  %v1620_v37 = vld [vmem:[#allocation4 + $0x38] sm:$0xf0] }
  0x61   :  { %1011 = vmatpush.bf16.msra.mxu2 %v1763_v55  ;;  %v1623_v38 = vor.u32 %v2014_v35, %v1620_v37  ;;  %v2065_v55 = vld [vmem:[#allocation4 + $0x1c4] sm:$0xf0]  ;;  %v2068_v35 = vld [vmem:[#allocation4 + $0x1e4] sm:$0xf] }
  0x62   :  { %1024 = vmatpush.bf16.msra.mxu3 %v1827_v30  ;;  %v1819_v56 = vor.u32 %v2065_v55, %v1818_v39  ;;  %v1844_v30 = vld [vmem:[#allocation4 + $0x1f8] sm:$0xf0]  ;;  %v1756_v39 = vld [vmem:[#allocation4 + $0x148] sm:$0xf0] }
  0x63   :  { %986 = vmatpush.bf16.msra.mxu0 %v1627_v40  ;;  %v2032_v40 = vld [vmem:[#allocation4 + $0xc4] sm:$0xf]  ;;  %v1847_v31 = vor.u32 %v2070_v29, %v1844_v30 }
  0x64   :  { %999 = vmatpush.bf16.msra.mxu1 %v1691_v42  ;;  %v1695_v42 = vor.u32 %v2032_v40, %v1692_v41  ;;  %v1828_v41 = vld [vmem:[#allocation4 + $0x1d8] sm:$0xf0] }
  0x65   :  { %1012 = vmatpush.bf16.msra.mxu2 %v1755_v24  ;;  %v2057_v24 = vld [vmem:[#allocation4 + $0x184] sm:$0xf0] }
  0x66   :  { %1025 = vmatpush.bf16.msra.mxu3 %v1819_v56  ;;  %v1787_v27 = vor.u32 %v2057_v24, %v1786_v22  ;;  %v2066_v56 = vld [vmem:[#allocation4 + $0x1d4] sm:$0xf] }
  0x67   :  { %987 = vmatpush.bf16.msra.mxu0 %v1619_v45  ;;  %v2012_v45 = vld [vmem:[#allocation4 + $0x24] sm:$0xf]  ;;  %v1831_v43 = vor.u32 %v2066_v56, %v1828_v41  ;;  %v2087_v56 = vld [vmem:[#allocation6 + $0x78] sm:$0xff] }
  0x68   :  { %1000 = vmatpush.bf16.msra.mxu1 %v1683_v48  ;;  %v1615_v48 = vor.u32 %v2012_v45, %v1612_v47  ;;  %v2046_v45 = vld [vmem:[#allocation4 + $0x134] sm:$0xf] }
  0x69   :  { %1013 = vmatpush.bf16.msra.mxu2 %v1747_v36  ;;  %v1836_v36 = vld [vmem:[#allocation4 + $0x1e8] sm:$0xf0] }
  0x6a   :  { %v1839_v37 = vor.u32 %v2068_v35, %v1836_v36 }
  0x6b   :  { %988 = vmatpush.bf16.msra.mxu0 %v1611_v51  ;;  %v1811_v51 = vor.u32 %v2063_v50, %v1810_v49  ;;  %v2064_v49 = vld [vmem:[#allocation4 + $0x1c4] sm:$0xf]  ;;  %v1820_v50 = vld [vmem:[#allocation4 + $0x1c8] sm:$0xf0] }
  0x6c   :  { %1001 = vmatpush.bf16.msra.mxu1 %v1675_v54  ;;  %v1687_v54 = vor.u32 %v2030_v52, %v1684_v53  ;;  %v2044_v52 = vld [vmem:[#allocation4 + $0x124] sm:$0xf]  ;;  %v1740_v53 = vld [vmem:[#allocation4 + $0x128] sm:$0xf0] }
  0x6d   :  { %1014 = vmatpush.bf16.msra.mxu2 %v1739_v46  ;;  %1026 = vmatpush.bf16.msra.mxu3 %v1811_v51  ;;  %v1748_v46 = vld [vmem:[#allocation4 + $0x138] sm:$0xf0]  ;;  %v1823_v51 = vor.u32 %v2064_v49, %v1820_v50  ;;  %v1743_v57 = vor.u32 %v2044_v52, %v1740_v53  ;;  %v2084_v49 = vld [vmem:[#allocation6 + $0x60] sm:$0xff]  ;;  %v2082_v53 = vld [vmem:[#allocation6 + $0x50] sm:$0xff] }
  0x6e   :  { %v1751_v47 = vor.u32 %v2046_v45, %v1748_v46  ;;  %v2085_v45 = vld [vmem:[#allocation6 + $0x68] sm:$0xff]  ;;  %v2083_v50 = vld [vmem:[#allocation6 + $0x58] sm:$0xff] }
  0x6f   :  { %989 = vmatpush.bf16.msra.mxu0 %v1603_v59  ;;  %v2010_v59 = vld [vmem:[#allocation4 + $0x14] sm:$0xf] }
  0x70   :  { %1002 = vmatpush.bf16.msra.mxu1 %v1667_v63  ;;  %v2061_v63 = vld [vmem:[#allocation4 + $0x1a4] sm:$0xf0]  ;;  %v1607_v0 = vor.u32 %v2010_v59, %v1604_v61  ;;  %v1812_v61 = vld [vmem:[#allocation4 + $0x1b8] sm:$0xf0] }
  0x71   :  { %v1803_v1 = vor.u32 %v2061_v63, %v1802_v62  ;;  %1015 = vmatpush.bf16.msra.mxu2 %v1731_v60  ;;  %v2062_v60 = vld [vmem:[#allocation4 + $0x1b4] sm:$0xf] }
  0x73   :  { %990 = vmatpush.bf16.msra.mxu0 %v1595_v5  ;;  %v1679_v5 = vor.u32 %v2028_v2, %v1676_v3  ;;  %1027 = vmatpush.bf16.msra.mxu3 %v1803_v1  ;;  %v2042_v1 = vld [vmem:[#allocation4 + $0x114] sm:$0xf]  ;;  %v1732_v2 = vld [vmem:[#allocation4 + $0x118] sm:$0xf0] }
  0x74   :  { %1003 = vmatpush.bf16.msra.mxu1 %v1659_v7  ;;  %v2008_v7 = vld [vmem:[#allocation4 + $0x4] sm:$0xf] }
  0x77   :  { %1035 = vmatpush.bf16.msrb.mxu0 %v1655_v6  ;;  %v2041_v6 = vld [vmem:[#allocation4 + $0x104] sm:$0xf0]  ;;  %1028 = vmatpush.bf16.msra.mxu3 %v1795_v18  ;;  %v1791_v18 = vor.u32 %v2056_v16, %v1788_v17 }
  0x78   :  { %1048 = vmatpush.bf16.msrb.mxu1 %v1719_v10  ;;  %v1723_v9 = vor.u32 %v2041_v6, %v1722_v4  ;;  %v1599_v10 = vor.u32 %v2008_v7, %v1596_v8  ;;  %v1735_v4 = vor.u32 %v2042_v1, %v1732_v2  ;;  %v1804_v6 = vld [vmem:[#allocation4 + $0x1a8] sm:$0xf0]  ;;  %v2040_v8 = vld [vmem:[#allocation4 + $0x104] sm:$0xf] }
  0x79   :  { %v2093_v1 = vld [vmem:[#allocation7 + $0x28] sm:$0xff] }
  0x7a   :  { %1016 = vmatpush.bf16.msra.mxu2 %v1723_v9  ;;  %v1724_v9 = vld [vmem:[#allocation4 + $0x108] sm:$0xf0] }
  0x7b   :  { %1036 = vmatpush.bf16.msrb.mxu0 %v1647_v11  ;;  %v2054_v11 = vld [vmem:[#allocation4 + $0x174] sm:$0xf]  ;;  %1029 = vmatpush.bf16.msra.mxu3 %v1787_v27 }
  0x7c   :  { %1049 = vmatpush.bf16.msrb.mxu1 %v1711_v20  ;;  %v2052_v20 = vld [vmem:[#allocation4 + $0x164] sm:$0xf] }
  0x7d   :  { %v1775_v23 = vor.u32 %v2052_v20, %v1772_v21 }
  0x7f   :  { %1037 = vmatpush.bf16.msrb.mxu0 %v1639_v14  ;;  %v1783_v14 = vor.u32 %v2054_v11, %v1780_v12  ;;  %1074 = vmatpush.bf16.msrb.mxu3 %v1847_v31  ;;  %v1727_v11 = vor.u32 %v2040_v8, %v1724_v9  ;;  %v1796_v12 = vld [vmem:[#allocation4 + $0x198] sm:$0xf0] }
  0x80   :  { %1050 = vmatpush.bf16.msrb.mxu1 %v1703_v32  ;;  %v2050_v32 = vld [vmem:[#allocation4 + $0x154] sm:$0xf] }
  0x81   :  { %1061 = vmatpush.bf16.msrb.mxu2 %v1783_v14  ;;  %v1767_v34 = vor.u32 %v2050_v32, %v1764_v33 }
  0x83   :  { %1038 = vmatpush.bf16.msrb.mxu0 %v1631_v26  ;;  %v1660_v26 = vld [vmem:[#allocation4 + $0x88] sm:$0xf0]  ;;  %1075 = vmatpush.bf16.msrb.mxu3 %v1839_v37  ;;  %v2079_v37 = vld [vmem:[#allocation6 + $0x38] sm:$0xff] }
  0x84   :  { %1051 = vmatpush.bf16.msrb.mxu1 %v1695_v42  ;;  %v1663_v28 = vor.u32 %v2024_v25, %v1660_v26 }
  0x85   :  { %1062 = vmatpush.bf16.msrb.mxu2 %v1775_v23 }
  0x87   :  { %1039 = vmatpush.bf16.msrb.mxu0 %v1623_v38  ;;  %v2048_v38 = vld [vmem:[#allocation4 + $0x144] sm:$0xf]  ;;  %1076 = vmatpush.bf16.msrb.mxu3 %v1831_v43  ;;  %v2086_v43 = vld [vmem:[#allocation6 + $0x70] sm:$0xff] }
  0x88   :  { %1052 = vmatpush.bf16.msrb.mxu1 %v1687_v54  ;;  %v1759_v55 = vor.u32 %v2048_v38, %v1756_v39  ;;  %v2078_v38 = vld [vmem:[#allocation6 + $0x30] sm:$0xff]  ;;  %v2077_v39 = vld [vmem:[#allocation6 + $0x28] sm:$0xff] }
  0x89   :  { %1063 = vmatpush.bf16.msrb.mxu2 %v1767_v34 }
  0x8b   :  { %1040 = vmatpush.bf16.msrb.mxu0 %v1615_v48  ;;  %1077 = vmatpush.bf16.msrb.mxu3 %v1823_v51 }
  0x8c   :  { %1053 = vmatpush.bf16.msrb.mxu1 %v1679_v5  ;;  %v2060_v5 = vld [vmem:[#allocation4 + $0x1a4] sm:$0xf] }
  0x8d   :  { %1064 = vmatpush.bf16.msrb.mxu2 %v1759_v55  ;;  %v1807_v7 = vor.u32 %v2060_v5, %v1804_v6  ;;  %v2076_v55 = vld [vmem:[#allocation6 + $0x20] sm:$0xff] }
  0x8f   :  { %1041 = vmatpush.bf16.msrb.mxu0 %v1607_v0  ;;  %v1815_v0 = vor.u32 %v2062_v60, %v1812_v61  ;;  %v2095_v61 = vld [vmem:[#allocation7 + $0x38] sm:$0xff] }
  0x90   :  { %1054 = vmatpush.bf16.msrb.mxu1 %v1671_v19 }
  0x91   :  { %1065 = vmatpush.bf16.msrb.mxu2 %v1751_v47  ;;  %1078 = vmatpush.bf16.msrb.mxu3 %v1815_v0 }
  0x93   :  { %1042 = vmatpush.bf16.msrb.mxu0 %v1599_v10  ;;  %v2058_v10 = vld [vmem:[#allocation4 + $0x194] sm:$0xf] }
  0x94   :  { %1055 = vmatpush.bf16.msrb.mxu1 %v1663_v28  ;;  %v1799_v14 = vor.u32 %v2058_v10, %v1796_v12 }
  0x95   :  { %1066 = vmatpush.bf16.msrb.mxu2 %v1743_v57  ;;  %1079 = vmatpush.bf16.msrb.mxu3 %v1807_v7 }
  0x99   :  { %1067 = vmatpush.bf16.msrb.mxu2 %v1735_v4  ;;  %1080 = vmatpush.bf16.msrb.mxu3 %v1799_v14 }
  0x9d   :  { %1068 = vmatpush.bf16.msrb.mxu2 %v1727_v11  ;;  %1081 = vmatpush.bf16.msrb.mxu3 %v1791_v18  ;;  %v2092_v18 = vld [vmem:[#allocation7 + $0x20] sm:$0xff] }
  0xb3   :  { %v485_v40 = vpop.f32.mrf.mxu0 }
  0xb4   :  { %v498_v42 = vpop.f32.mrf.mxu1 }
  0xb5   :  { %v2275_v44 = vadd.f32 %v498_v42, %v485_v40  ;;  %v2075_v40 = vld [vmem:[#allocation6 + $0x18] sm:$0xff]  ;;  %v2074_v42 = vld [vmem:[#allocation6 + $0x10] sm:$0xff] }
  0xb7   :  { %v595_v48 = vpack.c.bf16 %v2275_v44, %v2275_v44 }
  0xb9   :  { %991 = vmatmul.bf16.vlgmr.msra.gmra.mxu0 %v595_v48 }
  0xba   :  { %1223 = vmatpush.bf16.msra.mxu0 %v2079_v37 }
  0xbb   :  { %v511_v54 = vpop.f32.mrf.mxu2  ;;  %v487_v59 = vpop.f32.mrf.mxu0 }
  0xbc   :  { %v524_v58 = vpop.f32.mrf.mxu3  ;;  %v500_v63 = vpop.f32.mrf.mxu1  ;;  %v2080_v59 = vld [vmem:[#allocation6 + $0x40] sm:$0xff] }
  0xbd   :  { %v525_v62 = vadd.f32 %v524_v58, %v511_v54  ;;  %v2081_v54 = vld [vmem:[#allocation6 + $0x48] sm:$0xff]  ;;  %v2094_v63 = vld [vmem:[#allocation7 + $0x30] sm:$0xff] }
  0xbe   :  { %1224 = vmatpush.bf16.msra.mxu0 %v2078_v38 }
  0xbf   :  { %v596_v3 = vpack.c.bf16 %v525_v62, %v525_v62  ;;  %v584_v26 = vrot.slane %v525_v62, 6 }
  0xc1   :  { %1004 = vmatmul.bf16.vlgmr.msra.gmra.mxu1 %v596_v3  ;;  %v588_v32 = vsel %vm587_vm0, %v2275_v44, %v584_v26  ;;  %v2073_v44 = vld [vmem:[#allocation6 + $0x8] sm:$0xff] }
  0xc2   :  { %1225 = vmatpush.bf16.msra.mxu0 %v2077_v39  ;;  %1236 = vmatpush.bf16.msra.mxu1 %v2087_v56 }
  0xc3   :  { %v513_v13 = vpop.f32.mrf.mxu2 }
  0xc4   :  { %v526_v15 = vpop.f32.mrf.mxu3 }
  0xc6   :  { %1226 = vmatpush.bf16.msra.mxu0 %v2076_v55  ;;  %1237 = vmatpush.bf16.msra.mxu1 %v2086_v43 }
  0xc9   :  { %1043 = vmatmul.bf16.vlgmr.msrb.gmra.mxu0 %v595_v48  ;;  %v2072_v48 = vld [vmem:[#allocation6] sm:$0xff] }
  0xca   :  { %1227 = vmatpush.bf16.msra.mxu0 %v2075_v40  ;;  %1238 = vmatpush.bf16.msra.mxu1 %v2085_v45 }
  0xce   :  { %1228 = vmatpush.bf16.msra.mxu0 %v2074_v42  ;;  %1239 = vmatpush.bf16.msra.mxu1 %v2084_v49 }
  0xd1   :  { %1056 = vmatmul.bf16.vlgmr.msrb.gmra.mxu1 %v596_v3 }
  0xd2   :  { %1229 = vmatpush.bf16.msra.mxu0 %v2073_v44  ;;  %1240 = vmatpush.bf16.msra.mxu1 %v2083_v50 }
  0xd3   :  { %v537_v19 = vpop.f32.mrf.mxu0 }
  0xd4   :  { %v550_v20 = vpop.f32.mrf.mxu1 }
  0xd5   :  { %v551_v21 = vadd.f32 %v550_v20, %v537_v19  ;;  %v2091_v19 = vld [vmem:[#allocation7 + $0x18] sm:$0xff]  ;;  %v2090_v20 = vld [vmem:[#allocation7 + $0x10] sm:$0xff] }
  0xd6   :  { %1230 = vmatpush.bf16.msra.mxu0 %v2072_v48  ;;  %1241 = vmatpush.bf16.msra.mxu1 %v2082_v53 }
  0xd7   :  { %v597_v22 = vpack.c.bf16 %v551_v21, %v551_v21  ;;  %v585_v29 = vrot.slane %v551_v21, 4  ;;  %v2089_v21 = vld [vmem:[#allocation7 + $0x8] sm:$0xff] }
  0xd9   :  { %1017 = vmatmul.bf16.vlgmr.msra.gmra.mxu2 %v597_v22 }
  0xda   :  { %1242 = vmatpush.bf16.msra.mxu1 %v2081_v54  ;;  %1315 = vmatpush.bf16.msra.mxu2 %v2095_v61 }
  0xdb   :  { %v563_v23 = vpop.f32.mrf.mxu2  ;;  %v539_v25 = vpop.f32.mrf.mxu0 }
  0xdc   :  { %v576_v24 = vpop.f32.mrf.mxu3  ;;  %v552_v28 = vpop.f32.mrf.mxu1 }
  0xdd   :  { %v577_v27 = vadd.f32 %v576_v24, %v563_v23 }
  0xde   :  { %1243 = vmatpush.bf16.msra.mxu1 %v2080_v59  ;;  %1316 = vmatpush.bf16.msra.mxu2 %v2094_v63 }
  0xdf   :  { %v586_v30 = vrot.slane %v577_v27, 2  ;;  %v598_v31 = vpack.c.bf16 %v577_v27, %v577_v27 }
  0xe1   :  { %v590_v33 = vsel %vm589_vm1, %v585_v29, %v586_v30  ;;  %1030 = vmatmul.bf16.vlgmr.msra.gmra.mxu3 %v598_v31 }
  0xe2   :  { %v592_v34 = vsel %vm591_vm2, %v588_v32, %v590_v33  ;;  %1317 = vmatpush.bf16.msra.mxu2 %v2093_v1 }
  0xe3   :  { %594 = vst [vmem:[%s2299_s5] sm:$0xff] %v592_v34  ;;  %v565_v35 = vpop.f32.mrf.mxu2 }
  0xe4   :  { %v578_v36 = vpop.f32.mrf.mxu3 }
  0xe6   :  { %1318 = vmatpush.bf16.msra.mxu2 %v2092_v18 }
  0xe9   :  { %1069 = vmatmul.bf16.vlgmr.msrb.gmra.mxu2 %v597_v22  ;;  %v2088_v22 = vld [vmem:[#allocation7] sm:$0xff] }
  0xea   :  { %1319 = vmatpush.bf16.msra.mxu2 %v2091_v19 }
  0xee   :  { %1320 = vmatpush.bf16.msra.mxu2 %v2090_v20 }
  0xf1   :  { %1082 = vmatmul.bf16.vlgmr.msrb.gmra.mxu3 %v598_v31 }
  0xf2   :  { %1321 = vmatpush.bf16.msra.mxu2 %v2089_v21 }
  0xf6   :  { %1322 = vmatpush.bf16.msra.mxu2 %v2088_v22 }
 0x136   :  { %v992_v41 = vpop.f32.mrf.mxu0 }
 0x13e   :  { %v1005_v46 = vpop.f32.mrf.mxu1  ;;  %v994_v47 = vpop.f32.mrf.mxu0 }
 0x13f   :  { %v1006_v0 = vadd.f32 %v1005_v46, %v992_v41 }
 0x146   :  { %v1007_v51 = vpop.f32.mrf.mxu1  ;;  %v1044_v52 = vpop.f32.mrf.mxu0 }
 0x14e   :  { %v1057_v57 = vpop.f32.mrf.mxu1  ;;  %v1046_v58 = vpop.f32.mrf.mxu0 }
 0x14f   :  { %v1058_v9 = vadd.f32 %v1057_v57, %v1044_v52 }
 0x156   :  { %v1059_v60 = vpop.f32.mrf.mxu1 }
 0x15c   :  { %v1018_v62 = vpop.f32.mrf.mxu2 }
 0x15d   :  { %v1019_v2 = vadd.f32 %v1018_v62, %v1006_v0 }
 0x164   :  { %v1031_v3 = vpop.f32.mrf.mxu3  ;;  %v1020_v5 = vpop.f32.mrf.mxu2 }
 0x165   :  { %v1032_v4 = vadd.f32 %v1031_v3, %v1019_v2 }
 0x167   :  { %v1093_v6 = vpack.c.bf16 %v1032_v4, %v1032_v4 }
 0x169   :  { %1231 = vmatmul.bf16.vlgmr.msra.gmra.mxu0 %v1093_v6 }
 0x16c   :  { %v1033_v7 = vpop.f32.mrf.mxu3  ;;  %v1070_v8 = vpop.f32.mrf.mxu2 }
 0x16d   :  { %v1071_v10 = vadd.f32 %v1070_v8, %v1058_v9 }
 0x174   :  { %v1083_v11 = vpop.f32.mrf.mxu3  ;;  %v1072_v13 = vpop.f32.mrf.mxu2 }
 0x175   :  { %v1084_v12 = vadd.f32 %v1083_v11, %v1071_v10 }
 0x177   :  { %v1089_v14 = vrot.slane %v1084_v12, 6  ;;  %v1094_v15 = vpack.c.bf16 %v1084_v12, %v1084_v12 }
 0x179   :  { %v1090_v16 = vsel %vm587_vm0, %v1032_v4, %v1089_v14  ;;  %1244 = vmatmul.bf16.vlgmr.msra.gmra.mxu1 %v1094_v15 }
 0x17a   :  { %1092 = vst [vmem:[%s2299_s5 + $0x8] sm:$0xf] %v1090_v16 }
 0x17c   :  { %v1085_v17 = vpop.f32.mrf.mxu3 }
 0x1e6   :  { %v1232_v23 = vpop.f32.mrf.mxu0 }
 0x1ee   :  { %v1234_v24 = vpop.f32.mrf.mxu0 }
 0x1f6   :  { %v1245_v25 = vpop.f32.mrf.mxu1 }
 0x1f7   :  { %v1246_v26 = vadd.f32 %v1245_v25, %v1232_v23 }
 0x1f9   :  { %1249 = vst [vmem:[%s2299_s5 + $0xc] sm:$0x3] %v1246_v26  ;;  %v1250_v27 = vpack.c.bf16 %v1246_v26, %v1246_v26 }
 0x1fb   :  { %1323 = vmatmul.bf16.vlgmr.msra.gmra.mxu2 %v1250_v27 }
 0x1fe   :  { %v1247_v28 = vpop.f32.mrf.mxu1 }
 0x27e   :  { %v1324_v29 = vpop.f32.mrf.mxu2 }
 0x27f   :  { %1328 = vst [vmem:[%s2299_s5 + $0xe] sm:$0x3] %v1324_v29 }
 0x286   :  { %v1326_v30 = vpop.f32.mrf.mxu2 }
 0x287   :  { %1333 = vsyncpa [#allocation3], 1 }
 0x288   :  { %1334 = vsyncpa [#allocation5], 1 }
 0x289   :  { %1335 = vsyncpa [#allocation8], 1 }

</bundles_post_ra>
